<compile_context>
chip_gen: v5e
topology: v5e:2x2
jax: 0.10.0
libtpu: 0.0.40
codegen_flags: <defaults>
</compile_context>

<pallas_src>
import functools

import jax
import jax.numpy as jnp
from jax.experimental import pallas as pl
from jax.experimental.pallas import tpu as pltpu


# ----------------------------------------------------------------------------
# Parameter setup (mirrors PositionalEncoding.getPositionalEncoding)
# ----------------------------------------------------------------------------
def get_positional_encoding(seq_len: int, d_model: int) -> jnp.ndarray:
    position = jnp.arange(seq_len, dtype=jnp.float32)[:, None]          # (S, 1)
    div_term = 1.0 / (10000.0 ** (2.0 * position / float(d_model)))     # (S, 1)
    angle = position * div_term                                         # (S, 1)
    col = jnp.arange(d_model, dtype=jnp.int32)[None, :]                 # (1, D)
    # even columns <- sin(angle), odd columns <- cos(angle) (broadcast assign)
    pe = jnp.where(col % 2 == 0, jnp.sin(angle), jnp.cos(angle))        # (S, D)
    return pe.astype(jnp.float32)


# ----------------------------------------------------------------------------
# Pallas kernels
# ----------------------------------------------------------------------------
def _pe_add_kernel(x_ref, pe_ref, o_ref):
    # x_ref: (TB, S*D), pe_ref: (1, S*D) -> broadcast add over the row axis.
    o_ref[...] = (x_ref[...] + pe_ref[...]).astype(o_ref.dtype)


def _pe_add_dropout_kernel(x_ref, pe_ref, bits_ref, o_ref, *, p_drop):
    y = x_ref[...] + pe_ref[...]
    # Inverted dropout: compare raw uint32 bits against an integer threshold,
    # fold the 1/(1-p) scale into a single select (no float-convert chain).
    threshold = jnp.uint32(min(int(round(p_drop * (2.0 ** 32))), 2 ** 32 - 1))
    keep = bits_ref[...] >= threshold
    scale = jnp.float32(1.0 / (1.0 - p_drop))
    o_ref[...] = jnp.where(keep, y * scale, jnp.float32(0.0)).astype(o_ref.dtype)


# ----------------------------------------------------------------------------
# Tiling helper: largest legal batch tile under a VMEM-friendly byte budget
# ----------------------------------------------------------------------------
def _choose_batch_tile(batch: int, row_bytes: int, target_bytes: int) -> int:
    # Legal tiles: divide `batch`, and are a multiple of 8 or equal to `batch`
    # (TPU (8, 128) block rule on the second-to-last dim).
    candidates = [tb for tb in range(1, batch + 1)
                  if batch % tb == 0 and (tb % 8 == 0 or tb == batch)]
    fitting = [tb for tb in candidates if tb * row_bytes <= target_bytes]
    if fitting:
        return max(fitting)
    return min(candidates)


# ----------------------------------------------------------------------------
# Wrapper
# ----------------------------------------------------------------------------
def positional_encoding_forward(x, pe, *, dropout=0.1, training=False,
                                rng_key=None, block_bytes=4 << 20):
    """x: (B, S, D) float32, pe: (S, D) float32 -> (B, S, D) float32."""
    B, S, D = x.shape
    assert pe.shape == (S, D)
    SD = S * D

    # Lane-dense flat layout: each row is one batch element's full (S*D) slab.
    x2 = x.reshape(B, SD)
    pe2 = pe.reshape(1, SD)

    itemsize = jnp.dtype(x.dtype).itemsize
    TB = _choose_batch_tile(B, SD * itemsize, block_bytes)
    grid = (B // TB,)

    in_specs = [
        pl.BlockSpec((TB, SD), lambda i: (i, 0)),   # x tile
        pl.BlockSpec((1, SD), lambda i: (0, 0)),    # pe, resident across grid
    ]
    inputs = [x2, pe2]
    extra_bytes = 0

    use_dropout = bool(training) and float(dropout) > 0.0
    if use_dropout:
        if rng_key is None:
            rng_key = jax.random.PRNGKey(0)
        bits = jax.random.bits(rng_key, (B, SD), dtype=jnp.uint32)
        in_specs.append(pl.BlockSpec((TB, SD), lambda i: (i, 0)))
        inputs.append(bits)
        extra_bytes = B * SD * 4
        kernel = functools.partial(_pe_add_dropout_kernel, p_drop=float(dropout))
    else:
        kernel = _pe_add_kernel

    cost = pl.CostEstimate(
        flops=B * SD,
        transcendentals=0,
        bytes_accessed=2 * B * SD * itemsize + SD * itemsize + extra_bytes,
    )

    out2 = pl.pallas_call(
        kernel,
        out_shape=jax.ShapeDtypeStruct((B, SD), x.dtype),
        grid=grid,
        in_specs=in_specs,
        out_specs=pl.BlockSpec((TB, SD), lambda i: (i, 0)),
        compiler_params=pltpu.CompilerParams(
            dimension_semantics=("parallel",),      # independent rows -> both v7x TCs
            vmem_limit_bytes=48 * 1024 * 1024,      # headroom for double-buffered tiles
        ),
        cost_estimate=cost,
    )(*inputs)

    return out2.reshape(B, S, D)


# ----------------------------------------------------------------------------
# Main
# ----------------------------------------------------------------------------
if __name__ == "__main__":
    B, S, D = 2, 8, 32
    key = jax.random.PRNGKey(0)
    x = jax.random.normal(key, (B, S, D), dtype=jnp.float32)

    pe = get_positional_encoding(S, D)

    # Eval mode (dropout = identity): deterministic, verify against reference.
    out = positional_encoding_forward(x, pe, dropout=0.1, training=False)
    out = jax.block_until_ready(out)

    ref = x + pe[None, :, :]
    assert out.shape == (B, S, D)
    assert jnp.allclose(out, ref, atol=1e-6, rtol=1e-6)

    # Training mode (inverted dropout with externally generated random bits).
    out_train = positional_encoding_forward(
        x, pe, dropout=0.1, training=True, rng_key=jax.random.PRNGKey(123)
    )
    out_train = jax.block_until_ready(out_train)
    assert out_train.shape == (B, S, D)
    # Kept elements are exactly (x + pe) / (1 - p); dropped elements are 0.
    scaled = ref / (1.0 - 0.1)
    match = jnp.isclose(out_train, scaled, atol=1e-5) | jnp.isclose(out_train, 0.0)
    assert bool(jnp.all(match))

    print("KERNEL_OK")
</pallas_src>

<mosaic_0001>
module attributes {stable_mosaic.version = 11 : i64} {
  func.func @_pe_add_kernel(%arg0: i32, %arg1: memref<2x256xf32, #tpu.memory_space<vmem>>, %arg2: memref<1x256xf32, #tpu.memory_space<vmem>>, %arg3: memref<2x256xf32, #tpu.memory_space<vmem>>) attributes {dimension_semantics = [#tpu.dimension_semantics<parallel>], iteration_bounds = array<i64: 1>, scalar_prefetch = 0 : i64, scratch_operands = 0 : i64, tpu.core_type = #tpu.core_type<tc>, window_params = [{transform_indices = @transform_0, window_bounds = array<i64: 2, 256>}, {pipeline_mode = #tpu.pipeline_mode<synchronous>, transform_indices = @transform_1, window_bounds = array<i64: 1, 256>}, {transform_indices = @transform_2, window_bounds = array<i64: 2, 256>}]} {
    %c0 = arith.constant 0 : index
    %c0_0 = arith.constant 0 : index
    %0 = vector.load %arg1[%c0, %c0_0] : memref<2x256xf32, #tpu.memory_space<vmem>>, vector<2x256xf32>
    %c0_1 = arith.constant 0 : index
    %c0_2 = arith.constant 0 : index
    %1 = vector.load %arg2[%c0_1, %c0_2] : memref<1x256xf32, #tpu.memory_space<vmem>>, vector<1x256xf32>
    %2 = vector.broadcast %1 : vector<1x256xf32> to vector<2x256xf32>
    %3 = arith.addf %0, %2 : vector<2x256xf32>
    %c0_3 = arith.constant 0 : index
    %c0_4 = arith.constant 0 : index
    %4 = vector.load %arg3[%c0_3, %c0_4] : memref<2x256xf32, #tpu.memory_space<vmem>>, vector<2x256xf32>
    tpu.vector_store %arg3[%c0_3, %c0_4], %3 {strides = array<i32>} : memref<2x256xf32, #tpu.memory_space<vmem>>, vector<2x256xf32>,
    return
  }
  func.func @transform_0(%arg0: i32) -> (i32, i32) {
    %c0_i32 = arith.constant 0 : i32
    %c0_i32_0 = arith.constant 0 : i32
    return %arg0, %c0_i32 : i32, i32
  }
  func.func @transform_1(%arg0: i32) -> (i32, i32) {
    %c0_i32 = arith.constant 0 : i32
    %c0_i32_0 = arith.constant 0 : i32
    %c0_i32_1 = arith.constant 0 : i32
    return %c0_i32, %c0_i32_0 : i32, i32
  }
  func.func @transform_2(%arg0: i32) -> (i32, i32) {
    %c0_i32 = arith.constant 0 : i32
    %c0_i32_0 = arith.constant 0 : i32
    return %arg0, %c0_i32 : i32, i32
  }
}

</mosaic_0001>

<bundles_post_ra>
// kernel: tpu_custom_call.1
= control target key start
LH: loop header
LB: loop body
LE: loop exit
PB: predicated region body
PF: predicated region fallthrough
CT: control target
= control target key end

     0   :  { %7 = vsyncpa [#allocation3], 0  ;;  %s177_s0 = inlined_call_operand.hbm [shape: f32[2,256], index: 0, kind: input, shape index: {}]   ;;  %s178_s1 = inlined_call_operand.hbm [shape: f32[1,256], index: 1, kind: input, shape index: {}]   ;;  %s179_s2 = inlined_call_operand.hbm [shape: f32[2,256], index: 2, kind: output, shape index: {}]  }
   0x1   :  { %8 = vsyncpa [#allocation6], 0 }
   0x2   :  { %9 = vsyncpa [#allocation4], 0  ;;  %s15_s11 = sshll.u32 %s177_s0, 4  ;;  %s150_s12 = smov [#allocation2]   ;;  %s16_s11 = int_to_ptr.hbm [resolvable:$true] %s15_s11 }
   0x3   :  { %s17_s13 = sshll.u32 %s150_s12, 4  ;;  %s26_s16 = sshll.u32 %s178_s1, 4  ;;  %s18_s13 = int_to_ptr.vmem [resolvable:$true] %s17_s13  ;;  %s27_s16 = int_to_ptr.hbm [resolvable:$true] %s26_s16 }
   0x4   :  { %20 = dma.hbm_to_vmem [thread:$0]  %s16_s11, 64, %s18_s13, [#allocation3]  }
   0x5   :  { %s151_s17 = smov [#allocation5]  }
   0x6   :  { %s28_s18 = sshll.u32 %s151_s17, 4  ;;  %s29_s18 = int_to_ptr.vmem [resolvable:$true] %s28_s18 }
   0x7   :  { %31 = dma.hbm_to_vmem [thread:$0]  %s27_s16, 32, %s29_s18, [#allocation6]  }
   0x8   :  { %144 = dma.done.wait [#allocation3], 64  }
   0x9   :  { %145 = vsyncadd [#allocation3], 4294967232 }
   0xa   :  { %146 = dma.done.wait [#allocation6], 32  }
   0xb   :  { %147 = vsyncadd [#allocation6], 4294967264  ;;  %v41_v0 = vld [vmem:[#allocation5] sm:$0x3]  ;;  %vm46_vm0 = vcmask 1041408   ;;  %s152_s0 = smov [#allocation7]  }
   0xc   :  { %v43_v1 = vperm.slane %v41_v0, 0  ;;  %v44_v2 = vperm.slane %v41_v0, 1  ;;  %v40_v3 = vld [vmem:[#allocation2] sm:$0xf]  ;;  %s56_s19 = sshll.u32 %s152_s0, 4  ;;  %s58_s21 = sshll.u32 %s179_s2, 4  ;;  %s57_s19 = int_to_ptr.vmem [resolvable:$true] %s56_s19  ;;  %s59_s21 = int_to_ptr.hbm [resolvable:$true] %s58_s21 }
   0xe   :  { %v45_v4 = vrot.slane %v44_v2, 6 }
  0x10   :  { %v47_v5 = vsel %vm46_vm0, %v43_v1, %v45_v4 }
  0x11   :  { %v49_v6 = vadd.f32 %v47_v5, %v40_v3 }
  0x13   :  { %50 = vst [vmem:[#allocation7] sm:$0xf] %v49_v6 }
  0x14   :  { %61 = dma.vmem_to_hbm [thread:$0]  %s57_s19, 64, %s59_s21, [#allocation4]  }
  0x15   :  { %148 = dma.done.wait [#allocation4], 64  }
  0x16   :  { %149 = vsyncadd [#allocation4], 4294967232 }
  0x17   :  { %66 = vsyncpa [#allocation3], 1 }
  0x18   :  { %67 = vsyncpa [#allocation6], 1 }
  0x19   :  { %68 = vsyncpa [#allocation4], 1 }

</bundles_post_ra>
